<compile_context>
chip_gen: v6e
topology: v6e:2x2x1
jax: 0.10.0
libtpu: 0.0.40
codegen_flags: <defaults>
</compile_context>

<pallas_src>
import functools

import jax
import jax.numpy as jnp
from jax.experimental import pallas as pl
from jax.experimental.pallas import tpu as pltpu


def _round_up(x, m):
    return ((x + m - 1) // m) * m


def neumf_kernel(u_ref, i_ref,
                 w1u_ref, w1i_ref, b1_ref,
                 w2_ref, b2_ref,
                 w3_ref, b3_ref,
                 wf_mf_ref, wf_mlp_ref, bf_ref,
                 out_ref):
    f32 = jnp.float32

    u = u_ref[...]                       # (tb, 2D) fused [mf | mlp], bf16/f32
    i = i_ref[...]                       # (tb, 2D)

    # --- GMF branch fused with its final-layer contribution (VPU + XLU). ---
    # wf_mf is zero in the MLP-lane positions, so the masked lane-reduce of the
    # full fused product equals sum(u_mf * i_mf * wf_mf).
    prod = u.astype(f32) * i.astype(f32)                              # (tb, 2D)
    logit = jnp.sum(prod * wf_mf_ref[...].astype(f32),
                    axis=-1, keepdims=True)                           # (tb, 1)

    # --- MLP branch.  Layer 1 as two K=2D matmuls with zero-padded weight
    #     halves (no lane-axis concat, no lane sub-slicing). ---
    h = (jnp.dot(u, w1u_ref[...], preferred_element_type=f32)
         + jnp.dot(i, w1i_ref[...], preferred_element_type=f32))
    h = jnp.maximum(h + b1_ref[...], 0.0)                             # (tb, h1)

    h = jnp.dot(h.astype(w2_ref.dtype), w2_ref[...],
                preferred_element_type=f32)
    h = jnp.maximum(h + b2_ref[...], 0.0)                             # (tb, h2)

    h = jnp.dot(h.astype(w3_ref.dtype), w3_ref[...],
                preferred_element_type=f32)
    h = jnp.maximum(h + b3_ref[...], 0.0)                             # (tb, h3)

    # --- Final projection (MLP half) on the VPU: lane-reduce, not an MXU pass.
    logit = (logit
             + jnp.sum(h * wf_mlp_ref[...].astype(f32),
                       axis=-1, keepdims=True)
             + bf_ref[...])                                           # (tb, 1)

    out_ref[...] = jax.nn.sigmoid(logit).astype(out_ref.dtype)


def _choose_tile(B, tile_b):
    """Pick a batch tile that amortizes per-step overhead without gross padding.

    - Target tiles of ~tile_b rows (multiple of 128).
    - For B >= 256 force >= 2 grid steps so both v7x TensorCores are used.
    - For tiny batches shrink to a multiple of 8 (sublane) instead of 128.
    """
    tb_target = max(128, (tile_b // 128) * 128)
    num_tiles = pl.cdiv(B, tb_target)
    if B >= 256:
        num_tiles = max(num_tiles, 2)
    granularity = 128 if B >= 128 else 8
    tb = _round_up(pl.cdiv(B, num_tiles), granularity)
    num_tiles = pl.cdiv(B, tb)
    return tb, num_tiles * tb


def neumf_forward(params, user_ids, item_ids, *, tile_b=1024):
    # Embedding lookups (gathers) as plain-JAX glue: 2 gathers on fused
    # 128-wide [mf | mlp] tables instead of 4 gathers on 64-wide tables.
    u = params["user_emb"][user_ids]      # (B, 2D)
    i = params["item_emb"][item_ids]      # (B, 2D)

    B, two_d = u.shape
    h1 = params["b1"].shape[-1]
    h2 = params["b2"].shape[-1]
    h3 = params["b3"].shape[-1]

    tb, B_pad = _choose_tile(B, tile_b)
    pad = B_pad - B
    if pad:
        u = jnp.pad(u, ((0, pad), (0, 0)))
        i = jnp.pad(i, ((0, pad), (0, 0)))

    grid = (B_pad // tb,)

    act_spec = pl.BlockSpec((tb, two_d), lambda g: (g, 0))

    def resident(shape):  # weights/biases: same block every grid step
        return pl.BlockSpec(shape, lambda g: (0, 0))

    in_specs = [
        act_spec, act_spec,                                   # fused embeddings
        resident((two_d, h1)), resident((two_d, h1)), resident((1, h1)),
        resident((h1, h2)), resident((1, h2)),
        resident((h2, h3)), resident((1, h3)),
        resident((1, two_d)), resident((1, h3)), resident((1, 1)),
    ]
    out_spec = pl.BlockSpec((tb, 1), lambda g: (g, 0))

    out = pl.pallas_call(
        neumf_kernel,
        out_shape=jax.ShapeDtypeStruct((B_pad, 1), jnp.float32),
        grid=grid,
        in_specs=in_specs,
        out_specs=out_spec,
        compiler_params=pltpu.CompilerParams(
            dimension_semantics=("parallel",)),
    )(u, i,
      params["w1_user"], params["w1_item"], params["b1"],
      params["w2"], params["b2"],
      params["w3"], params["b3"],
      params["wf_mf"], params["wf_mlp"], params["bf"])

    # Matches torch's .squeeze() on a (B, 1) tensor -> (B,)
    return jnp.squeeze(out[:B], axis=-1)


def xavier_uniform(key, fan_in, fan_out, shape):
    limit = jnp.sqrt(6.0 / (fan_in + fan_out))
    return jax.random.uniform(key, shape, jnp.float32, minval=-limit, maxval=limit)


def init_params(key, num_users, num_items, embedding_dim=64,
                hidden_dims=(128, 64, 32), dtype=jnp.bfloat16):
    """Build parameters in the kernel's fused / zero-padded layout.

    dtype=bf16 (default) halves HBM traffic for tables and weights; biases are
    kept f32 and all kernel accumulation / activation math is f32.
    """
    ks = jax.random.split(key, 8)
    D = embedding_dim
    h1, h2, h3 = hidden_dims

    # Embeddings: normal(std=0.01) like nn.init.normal_(std=0.01)
    u_mf = 0.01 * jax.random.normal(ks[0], (num_users, D))
    i_mf = 0.01 * jax.random.normal(ks[1], (num_items, D))
    u_mlp = 0.01 * jax.random.normal(ks[2], (num_users, D))
    i_mlp = 0.01 * jax.random.normal(ks[3], (num_items, D))

    # Linear weights stored pre-transposed as (in, out).
    w1 = xavier_uniform(ks[4], 2 * D, h1, (2 * D, h1))   # rows: [user_mlp | item_mlp]
    w2 = xavier_uniform(ks[5], h1, h2, (h1, h2))
    w3 = xavier_uniform(ks[6], h2, h3, (h2, h3))
    wf = xavier_uniform(ks[7], D + h3, 1, (1, D + h3))   # row-vector form

    zeros_top = jnp.zeros((D, h1), jnp.float32)          # MF lanes contribute 0 to MLP
    params = {
        # Fused per-entity tables: lanes [0:D] = MF, lanes [D:2D] = MLP.
        "user_emb": jnp.concatenate([u_mf, u_mlp], axis=-1).astype(dtype),
        "item_emb": jnp.concatenate([i_mf, i_mlp], axis=-1).astype(dtype),
        # Layer-1 weight halves, zero-padded to K = 2D (fused-lane input).
        "w1_user": jnp.concatenate([zeros_top, w1[:D]], axis=0).astype(dtype),
        "w1_item": jnp.concatenate([zeros_top, w1[D:]], axis=0).astype(dtype),
        "b1": jnp.zeros((1, h1), jnp.float32),
        "w2": w2.astype(dtype), "b2": jnp.zeros((1, h2), jnp.float32),
        "w3": w3.astype(dtype), "b3": jnp.zeros((1, h3), jnp.float32),
        # Final-layer MF weights zero-padded to 2D lanes; MLP half kept as-is.
        "wf_mf": jnp.concatenate([wf[:, :D], jnp.zeros((1, D), jnp.float32)],
                                 axis=1).astype(dtype),
        "wf_mlp": wf[:, D:].astype(dtype),
        "bf": jnp.zeros((1, 1), jnp.float32),
    }
    return params


def ref_forward(params, user_ids, item_ids):
    """Pure-JAX f32 reference mirroring the torch forward (eval mode)."""
    f32 = jnp.float32
    hi = jax.lax.Precision.HIGHEST
    two_d = params["user_emb"].shape[-1]
    D = two_d // 2

    u = params["user_emb"][user_ids].astype(f32)
    i = params["item_emb"][item_ids].astype(f32)
    mf = u[:, :D] * i[:, :D]
    x = jnp.concatenate([u[:, D:], i[:, D:]], axis=-1)

    w1 = jnp.concatenate([params["w1_user"][D:], params["w1_item"][D:]],
                         axis=0).astype(f32)
    x = jnp.maximum(jnp.dot(x, w1, precision=hi) + params["b1"], 0.0)
    x = jnp.maximum(jnp.dot(x, params["w2"].astype(f32), precision=hi)
                    + params["b2"], 0.0)
    x = jnp.maximum(jnp.dot(x, params["w3"].astype(f32), precision=hi)
                    + params["b3"], 0.0)

    c = jnp.concatenate([mf, x], axis=-1)
    wf = jnp.concatenate([params["wf_mf"][:, :D], params["wf_mlp"]],
                         axis=1).astype(f32).T
    return jax.nn.sigmoid(jnp.dot(c, wf, precision=hi) + params["bf"]).squeeze()


if __name__ == "__main__":
    key = jax.random.PRNGKey(0)
    k_params, k_u, k_i = jax.random.split(key, 3)

    num_users, num_items = 32, 48
    embedding_dim = 64
    hidden_dims = (128, 64, 32)
    batch = 8

    params = init_params(k_params, num_users, num_items,
                         embedding_dim, hidden_dims, dtype=jnp.bfloat16)

    user_ids = jax.random.randint(k_u, (batch,), 0, num_users, dtype=jnp.int32)
    item_ids = jax.random.randint(k_i, (batch,), 0, num_items, dtype=jnp.int32)

    fwd = jax.jit(functools.partial(neumf_forward, params))
    out = jax.block_until_ready(fwd(user_ids, item_ids))

    expected = ref_forward(params, user_ids, item_ids)
    assert out.shape == (batch,), f"bad shape {out.shape}"
    max_err = jnp.max(jnp.abs(out - expected))
    assert jnp.allclose(out, expected, atol=5e-3, rtol=1e-2), (
        f"mismatch: max err {max_err}")
    print("KERNEL_OK")
</pallas_src>

<mosaic_0001>
module attributes {stable_mosaic.version = 11 : i64} {
  func.func @neumf_kernel(%arg0: i32, %arg1: memref<8x128xbf16, #tpu.memory_space<vmem>>, %arg2: memref<8x128xbf16, #tpu.memory_space<vmem>>, %arg3: memref<128x128xbf16, #tpu.memory_space<vmem>>, %arg4: memref<128x128xbf16, #tpu.memory_space<vmem>>, %arg5: memref<1x128xf32, #tpu.memory_space<vmem>>, %arg6: memref<128x64xbf16, #tpu.memory_space<vmem>>, %arg7: memref<1x64xf32, #tpu.memory_space<vmem>>, %arg8: memref<64x32xbf16, #tpu.memory_space<vmem>>, %arg9: memref<1x32xf32, #tpu.memory_space<vmem>>, %arg10: memref<1x128xbf16, #tpu.memory_space<vmem>>, %arg11: memref<1x32xbf16, #tpu.memory_space<vmem>>, %arg12: memref<1x1xf32, #tpu.memory_space<vmem>>, %arg13: memref<8x1xf32, #tpu.memory_space<vmem>>) attributes {dimension_semantics = [#tpu.dimension_semantics<parallel>], iteration_bounds = array<i64: 1>, scalar_prefetch = 0 : i64, scratch_operands = 0 : i64, tpu.core_type = #tpu.core_type<tc>, window_params = [{transform_indices = @transform_0, window_bounds = array<i64: 8, 128>}, {transform_indices = @transform_1, window_bounds = array<i64: 8, 128>}, {pipeline_mode = #tpu.pipeline_mode<synchronous>, transform_indices = @transform_2, window_bounds = array<i64: 128, 128>}, {pipeline_mode = #tpu.pipeline_mode<synchronous>, transform_indices = @transform_3, window_bounds = array<i64: 128, 128>}, {pipeline_mode = #tpu.pipeline_mode<synchronous>, transform_indices = @transform_4, window_bounds = array<i64: 1, 128>}, {pipeline_mode = #tpu.pipeline_mode<synchronous>, transform_indices = @transform_5, window_bounds = array<i64: 128, 64>}, {pipeline_mode = #tpu.pipeline_mode<synchronous>, transform_indices = @transform_6, window_bounds = array<i64: 1, 64>}, {pipeline_mode = #tpu.pipeline_mode<synchronous>, transform_indices = @transform_7, window_bounds = array<i64: 64, 32>}, {pipeline_mode = #tpu.pipeline_mode<synchronous>, transform_indices = @transform_8, window_bounds = array<i64: 1, 32>}, {pipeline_mode = #tpu.pipeline_mode<synchronous>, transform_indices = @transform_9, window_bounds = array<i64: 1, 128>}, {pipeline_mode = #tpu.pipeline_mode<synchronous>, transform_indices = @transform_10, window_bounds = array<i64: 1, 32>}, {pipeline_mode = #tpu.pipeline_mode<synchronous>, transform_indices = @transform_11, window_bounds = array<i64: 1, 1>}, {transform_indices = @transform_12, window_bounds = array<i64: 8, 1>}]} {
    %c0 = arith.constant 0 : index
    %c0_0 = arith.constant 0 : index
    %0 = vector.load %arg1[%c0, %c0_0] : memref<8x128xbf16, #tpu.memory_space<vmem>>, vector<8x128xbf16>
    %c0_1 = arith.constant 0 : index
    %c0_2 = arith.constant 0 : index
    %1 = vector.load %arg2[%c0_1, %c0_2] : memref<8x128xbf16, #tpu.memory_space<vmem>>, vector<8x128xbf16>
    %2 = arith.extf %0 : vector<8x128xbf16> to vector<8x128xf32>
    %3 = arith.extf %1 : vector<8x128xbf16> to vector<8x128xf32>
    %4 = arith.mulf %2, %3 : vector<8x128xf32>
    %c0_3 = arith.constant 0 : index
    %c0_4 = arith.constant 0 : index
    %5 = vector.load %arg10[%c0_3, %c0_4] : memref<1x128xbf16, #tpu.memory_space<vmem>>, vector<1x128xbf16>
    %6 = arith.extf %5 : vector<1x128xbf16> to vector<1x128xf32>
    %7 = vector.broadcast %6 : vector<1x128xf32> to vector<8x128xf32>
    %8 = arith.mulf %4, %7 : vector<8x128xf32>
    %cst = arith.constant dense<0.000000e+00> : vector<8xf32>
    %9 = vector.multi_reduction <add>, %8, %cst [1] : vector<8x128xf32> to vector<8xf32>
    %10 = vector.shape_cast %9 : vector<8xf32> to vector<8x1xf32>
    %c0_5 = arith.constant 0 : index
    %c0_6 = arith.constant 0 : index
    %11 = vector.load %arg3[%c0_5, %c0_6] : memref<128x128xbf16, #tpu.memory_space<vmem>>, vector<128x128xbf16>
    %cst_7 = arith.constant dense<0.000000e+00> : vector<8x128xf32>
    %12 = tpu.matmul %0, %11, %cst_7 {dimension_numbers = #tpu.dot_dimension_numbers<[1], [0], [0], [1], [0, 0, 1, 1], [], []>} : vector<8x128xbf16>, vector<128x128xbf16>, vector<8x128xf32> -> vector<8x128xf32>
    %c0_8 = arith.constant 0 : index
    %c0_9 = arith.constant 0 : index
    %13 = vector.load %arg4[%c0_8, %c0_9] : memref<128x128xbf16, #tpu.memory_space<vmem>>, vector<128x128xbf16>
    %cst_10 = arith.constant dense<0.000000e+00> : vector<8x128xf32>
    %14 = tpu.matmul %1, %13, %cst_10 {dimension_numbers = #tpu.dot_dimension_numbers<[1], [0], [0], [1], [0, 0, 1, 1], [], []>} : vector<8x128xbf16>, vector<128x128xbf16>, vector<8x128xf32> -> vector<8x128xf32>
    %15 = arith.addf %12, %14 : vector<8x128xf32>
    %c0_11 = arith.constant 0 : index
    %c0_12 = arith.constant 0 : index
    %16 = vector.load %arg5[%c0_11, %c0_12] : memref<1x128xf32, #tpu.memory_space<vmem>>, vector<1x128xf32>
    %17 = vector.broadcast %16 : vector<1x128xf32> to vector<8x128xf32>
    %18 = arith.addf %15, %17 : vector<8x128xf32>
    %cst_13 = arith.constant 0.000000e+00 : f32
    %19 = vector.broadcast %cst_13 : f32 to vector<8x128xf32>
    %20 = arith.maximumf %18, %19 : vector<8x128xf32>
    %21 = arith.truncf %20 : vector<8x128xf32> to vector<8x128xbf16>
    %c0_14 = arith.constant 0 : index
    %c0_15 = arith.constant 0 : index
    %22 = vector.load %arg6[%c0_14, %c0_15] : memref<128x64xbf16, #tpu.memory_space<vmem>>, vector<128x64xbf16>
    %cst_16 = arith.constant dense<0.000000e+00> : vector<8x64xf32>
    %23 = tpu.matmul %21, %22, %cst_16 {dimension_numbers = #tpu.dot_dimension_numbers<[1], [0], [0], [1], [0, 0, 1, 1], [], []>} : vector<8x128xbf16>, vector<128x64xbf16>, vector<8x64xf32> -> vector<8x64xf32>
    %c0_17 = arith.constant 0 : index
    %c0_18 = arith.constant 0 : index
    %24 = vector.load %arg7[%c0_17, %c0_18] : memref<1x64xf32, #tpu.memory_space<vmem>>, vector<1x64xf32>
    %25 = vector.broadcast %24 : vector<1x64xf32> to vector<8x64xf32>
    %26 = arith.addf %23, %25 : vector<8x64xf32>
    %cst_19 = arith.constant 0.000000e+00 : f32
    %27 = vector.broadcast %cst_19 : f32 to vector<8x64xf32>
    %28 = arith.maximumf %26, %27 : vector<8x64xf32>
    %29 = arith.truncf %28 : vector<8x64xf32> to vector<8x64xbf16>
    %c0_20 = arith.constant 0 : index
    %c0_21 = arith.constant 0 : index
    %30 = vector.load %arg8[%c0_20, %c0_21] : memref<64x32xbf16, #tpu.memory_space<vmem>>, vector<64x32xbf16>
    %cst_22 = arith.constant dense<0.000000e+00> : vector<8x32xf32>
    %31 = tpu.matmul %29, %30, %cst_22 {dimension_numbers = #tpu.dot_dimension_numbers<[1], [0], [0], [1], [0, 0, 1, 1], [], []>} : vector<8x64xbf16>, vector<64x32xbf16>, vector<8x32xf32> -> vector<8x32xf32>
    %c0_23 = arith.constant 0 : index
    %c0_24 = arith.constant 0 : index
    %32 = vector.load %arg9[%c0_23, %c0_24] : memref<1x32xf32, #tpu.memory_space<vmem>>, vector<1x32xf32>
    %33 = vector.broadcast %32 : vector<1x32xf32> to vector<8x32xf32>
    %34 = arith.addf %31, %33 : vector<8x32xf32>
    %cst_25 = arith.constant 0.000000e+00 : f32
    %35 = vector.broadcast %cst_25 : f32 to vector<8x32xf32>
    %36 = arith.maximumf %34, %35 : vector<8x32xf32>
    %c0_26 = arith.constant 0 : index
    %c0_27 = arith.constant 0 : index
    %37 = vector.load %arg11[%c0_26, %c0_27] : memref<1x32xbf16, #tpu.memory_space<vmem>>, vector<1x32xbf16>
    %38 = arith.extf %37 : vector<1x32xbf16> to vector<1x32xf32>
    %39 = vector.broadcast %38 : vector<1x32xf32> to vector<8x32xf32>
    %40 = arith.mulf %36, %39 : vector<8x32xf32>
    %cst_28 = arith.constant dense<0.000000e+00> : vector<8xf32>
    %41 = vector.multi_reduction <add>, %40, %cst_28 [1] : vector<8x32xf32> to vector<8xf32>
    %42 = vector.shape_cast %41 : vector<8xf32> to vector<8x1xf32>
    %43 = arith.addf %10, %42 : vector<8x1xf32>
    %c0_29 = arith.constant 0 : index
    %c0_30 = arith.constant 0 : index
    %44 = vector.load %arg12[%c0_29, %c0_30] : memref<1x1xf32, #tpu.memory_space<vmem>>, vector<1x1xf32>
    %45 = vector.broadcast %44 : vector<1x1xf32> to vector<8x1xf32>
    %46 = arith.addf %43, %45 : vector<8x1xf32>
    %47 = arith.negf %46 : vector<8x1xf32>
    %48 = math.exp %47 : vector<8x1xf32>
    %cst_31 = arith.constant 1.000000e+00 : f32
    %49 = vector.broadcast %cst_31 : f32 to vector<8x1xf32>
    %50 = arith.addf %49, %48 : vector<8x1xf32>
    %51 = arith.divf %49, %50 : vector<8x1xf32>
    %c0_32 = arith.constant 0 : index
    %c0_33 = arith.constant 0 : index
    %52 = vector.load %arg13[%c0_32, %c0_33] : memref<8x1xf32, #tpu.memory_space<vmem>>, vector<8x1xf32>
    tpu.vector_store %arg13[%c0_32, %c0_33], %51 {strides = array<i32>} : memref<8x1xf32, #tpu.memory_space<vmem>>, vector<8x1xf32>,
    return
  }
  func.func @transform_0(%arg0: i32) -> (i32, i32) {
    %c0_i32 = arith.constant 0 : i32
    %c0_i32_0 = arith.constant 0 : i32
    return %arg0, %c0_i32 : i32, i32
  }
  func.func @transform_1(%arg0: i32) -> (i32, i32) {
    %c0_i32 = arith.constant 0 : i32
    %c0_i32_0 = arith.constant 0 : i32
    return %arg0, %c0_i32 : i32, i32
  }
  func.func @transform_2(%arg0: i32) -> (i32, i32) {
    %c0_i32 = arith.constant 0 : i32
    %c0_i32_0 = arith.constant 0 : i32
    %c0_i32_1 = arith.constant 0 : i32
    return %c0_i32, %c0_i32_0 : i32, i32
  }
  func.func @transform_3(%arg0: i32) -> (i32, i32) {
    %c0_i32 = arith.constant 0 : i32
    %c0_i32_0 = arith.constant 0 : i32
    %c0_i32_1 = arith.constant 0 : i32
    return %c0_i32, %c0_i32_0 : i32, i32
  }
  func.func @transform_4(%arg0: i32) -> (i32, i32) {
    %c0_i32 = arith.constant 0 : i32
    %c0_i32_0 = arith.constant 0 : i32
    %c0_i32_1 = arith.constant 0 : i32
    return %c0_i32, %c0_i32_0 : i32, i32
  }
  func.func @transform_5(%arg0: i32) -> (i32, i32) {
    %c0_i32 = arith.constant 0 : i32
    %c0_i32_0 = arith.constant 0 : i32
    %c0_i32_1 = arith.constant 0 : i32
    return %c0_i32, %c0_i32_0 : i32, i32
  }
  func.func @transform_6(%arg0: i32) -> (i32, i32) {
    %c0_i32 = arith.constant 0 : i32
    %c0_i32_0 = arith.constant 0 : i32
    %c0_i32_1 = arith.constant 0 : i32
    return %c0_i32, %c0_i32_0 : i32, i32
  }
  func.func @transform_7(%arg0: i32) -> (i32, i32) {
    %c0_i32 = arith.constant 0 : i32
    %c0_i32_0 = arith.constant 0 : i32
    %c0_i32_1 = arith.constant 0 : i32
    return %c0_i32, %c0_i32_0 : i32, i32
  }
  func.func @transform_8(%arg0: i32) -> (i32, i32) {
    %c0_i32 = arith.constant 0 : i32
    %c0_i32_0 = arith.constant 0 : i32
    %c0_i32_1 = arith.constant 0 : i32
    return %c0_i32, %c0_i32_0 : i32, i32
  }
  func.func @transform_9(%arg0: i32) -> (i32, i32) {
    %c0_i32 = arith.constant 0 : i32
    %c0_i32_0 = arith.constant 0 : i32
    %c0_i32_1 = arith.constant 0 : i32
    return %c0_i32, %c0_i32_0 : i32, i32
  }
  func.func @transform_10(%arg0: i32) -> (i32, i32) {
    %c0_i32 = arith.constant 0 : i32
    %c0_i32_0 = arith.constant 0 : i32
    %c0_i32_1 = arith.constant 0 : i32
    return %c0_i32, %c0_i32_0 : i32, i32
  }
  func.func @transform_11(%arg0: i32) -> (i32, i32) {
    %c0_i32 = arith.constant 0 : i32
    %c0_i32_0 = arith.constant 0 : i32
    %c0_i32_1 = arith.constant 0 : i32
    return %c0_i32, %c0_i32_0 : i32, i32
  }
  func.func @transform_12(%arg0: i32) -> (i32, i32) {
    %c0_i32 = arith.constant 0 : i32
    %c0_i32_0 = arith.constant 0 : i32
    return %arg0, %c0_i32 : i32, i32
  }
}

</mosaic_0001>

<bundles_post_ra>
// kernel: neumf_forward.1
= control target key start
LH: loop header
LB: loop body
LE: loop exit
PB: predicated region body
PF: predicated region fallthrough
CT: control target
= control target key end

     0   :  { %s965_s0 = inlined_call_operand.vmem [shape: bf16[8,128], index: 0, kind: input, shape index: {}]   ;;  %s966_s1 = inlined_call_operand.vmem [shape: bf16[8,128], index: 1, kind: input, shape index: {}]   ;;  %s967_s2 = inlined_call_operand.hbm [shape: bf16[128,128], index: 2, kind: input, shape index: {}]   ;;  %s968_s3 = inlined_call_operand.hbm [shape: bf16[128,128], index: 3, kind: input, shape index: {}]   ;;  %s969_s4 = inlined_call_operand.vmem [shape: f32[1,128], index: 4, kind: input, shape index: {}]   ;;  %s970_s5 = inlined_call_operand.vmem [shape: bf16[128,64], index: 5, kind: input, shape index: {}]   ;;  %s971_s6 = inlined_call_operand.vmem [shape: f32[1,64], index: 6, kind: input, shape index: {}]   ;;  %s972_s7 = inlined_call_operand.hbm [shape: bf16[64,32], index: 7, kind: input, shape index: {}]   ;;  %s973_s8 = inlined_call_operand.vmem [shape: f32[1,32], index: 8, kind: input, shape index: {}]   ;;  %s974_s9 = inlined_call_operand.vmem [shape: bf16[1,128], index: 9, kind: input, shape index: {}]   ;;  %s975_s10 = inlined_call_operand.vmem [shape: bf16[1,32], index: 10, kind: input, shape index: {}]   ;;  %s976_s11 = inlined_call_operand.<no memory space> [shape: f32[1,1], index: 11, kind: input, shape index: {}]   ;;  %s977_s12 = inlined_call_operand.vmem [shape: f32[8,1], index: 12, kind: output, shape index: {}]  }
   0x1   :  { %v17_v0 = vstv %s976_s11 }
   0x2   :  { %18 = vst [vmem:[#allocation2] sm:$0x1] %v17_v0 }
   0x3   :  { %19 = vsyncpa [#allocation4], 0 }
   0x4   :  { %20 = vsyncpa [#allocation6], 0  ;;  %s789_s23 = smov [#allocation5]   ;;  %s790_s25 = smov [#allocation3]  }
   0x5   :  { %s42_s24 = sshll.u32 %s789_s23, 4  ;;  %s30_s26 = sshll.u32 %s790_s25, 4  ;;  %s43_s24 = int_to_ptr.vmem [resolvable:$true] %s42_s24  ;;  %s31_s26 = int_to_ptr.vmem [resolvable:$true] %s30_s26 }
   0x6   :  { %s733_s27 = scalar_lea.vmem %s43_s24, 1024  ;;  %p738_p1 = scmp.lt.s32.totalorder %s43_s24, %s43_s24 }
   0x7   :  { %p734_p0 = scmp.ne.s32.totalorder %s43_s24, %s733_s27  ;;  %p739_p2 = scmp.lt.s32.totalorder %s733_s27, %s733_s27 }
   0x9   :  { %p740_p3 = por %p739_p2, %p738_p1 }
   0xb   :  { %p741_p4 = pnand %p740_p3, %p734_p0 }
   0xd   :  { %744 = shalt.err (!%p741_p4)
}
   0xe   :  { %s791_s28 = smov 64   ;;  %s792_s29 = smov 4  }
   0xf   :  { %48 = dma.hbm_to_vmem [thread:$0]  %s968_s3, 1024, %s43_s24, [#allocation6], %s791_s28, %s791_s28, %s792_s29  }
  0x10   :  { %s753_s13 = scalar_lea.vmem %s31_s26, 1024  ;;  %p758_p6 = scmp.lt.s32.totalorder %s31_s26, %s31_s26 }
  0x11   :  { %p754_p5 = scmp.ne.s32.totalorder %s31_s26, %s753_s13  ;;  %p759_p7 = scmp.lt.s32.totalorder %s753_s13, %s753_s13 }
  0x13   :  { %p760_p8 = por %p759_p7, %p758_p6 }
  0x15   :  { %p761_p9 = pnand %p760_p8, %p754_p5 }
  0x17   :  { %764 = shalt.err (!%p761_p9)
}
  0x18   :  { %36 = dma.hbm_to_vmem [thread:$0]  %s967_s2, 1024, %s31_s26, [#allocation4], %s791_s28, %s791_s28, %s792_s29  }
  0x19   :  { %s793_s16 = smov [#allocation7]  }
  0x1a   :  { %s60_s17 = sshll.u32 %s793_s16, 4  ;;  %s61_s17 = int_to_ptr.vmem [resolvable:$true] %s60_s17 }
  0x1b   :  { %s773_s18 = scalar_lea.vmem %s61_s17, 512  ;;  %p778_p11 = scmp.lt.s32.totalorder %s61_s17, %s61_s17 }
  0x1c   :  { %p774_p10 = scmp.ne.s32.totalorder %s61_s17, %s773_s18  ;;  %p779_p12 = scmp.lt.s32.totalorder %s773_s18, %s773_s18 }
  0x1e   :  { %p780_p13 = por %p779_p12, %p778_p11 }
  0x20   :  { %p781_p0 = pnand %p780_p13, %p774_p10 }
  0x22   :  { %784 = shalt.err (!%p781_p0)
}
  0x23   :  { %66 = dma.hbm_to_vmem [thread:$0]  %s972_s7, 512, %s61_s17, [#allocation6], %s791_s28, %s791_s28, %s792_s29  }
  0x24   :  { %785 = dma.done.wait [#allocation4], 1024  }
  0x25   :  { %786 = vsyncadd [#allocation4], 4294966272 }
  0x26   :  { %787 = dma.done.wait [#allocation6], 1536  }
  0x27   :  { %788 = vsyncadd [#allocation6], 4294965760  ;;  %v794_v1 = vmov 0.0   ;;  %vm795_vm0 = vmmov 0   ;;  %v693_v2 = vld [vmem:[#allocation5 + $0x38] sm:$0xff]   ;;  %v695_v4 = vld [vmem:[#allocation5 + $0x30] sm:$0xff]   ;;  %v92_v53 = vlaneseq }
  0x28   :  { %614 = vmatprep.subr.bf16.mxu0 %v794_v1  ;;  %634 = vmatprep.subr.bf16.mxu1 %v794_v1  ;;  %v694_v3 = vld [vmem:[#allocation3 + $0x38] sm:$0xff]   ;;  %v696_v5 = vld [vmem:[#allocation3 + $0x30] sm:$0xff]   ;;  %v697_v6 = vld [vmem:[#allocation5 + $0x28] sm:$0xff]   ;;  %vm469_vm1 = vcmask 523264   ;;  %vm521_vm2 = vcmask 261120   ;;  %vm540_vm3 = vcmask 7168  }
  0x29   :  { %630 = vmatprep.mubr.msk.bf16.mxu0 %vm795_vm0, %v794_v1  ;;  %650 = vmatprep.mubr.msk.bf16.mxu1 %vm795_vm0, %v794_v1  ;;  %v698_v7 = vld [vmem:[#allocation3 + $0x28] sm:$0xff]   ;;  %v699_v8 = vld [vmem:[#allocation5 + $0x20] sm:$0xff]   ;;  %v701_v10 = vld [vmem:[#allocation5 + $0x18] sm:$0xff]   ;;  %v93_v56 = vshrl.u32 %v92_v53, 7 }
  0x2a   :  { %615 = vmatpush3.bf16.msra.mxu0 %v693_v2  ;;  %635 = vmatpush3.bf16.msra.mxu1 %v694_v3  ;;  %v700_v9 = vld [vmem:[#allocation3 + $0x20] sm:$0xff]   ;;  %v702_v11 = vld [vmem:[#allocation3 + $0x18] sm:$0xff]   ;;  %v703_v12 = vld [vmem:[#allocation5 + $0x10] sm:$0xff]  }
  0x2b   :  { %616 = vmatprep.subr.bf16.mxu0 %v794_v1  ;;  %636 = vmatprep.subr.bf16.mxu1 %v794_v1  ;;  %v704_v13 = vld [vmem:[#allocation3 + $0x10] sm:$0xff]   ;;  %v705_v14 = vld [vmem:[#allocation5 + $0x8] sm:$0xff]   ;;  %v707_v16 = vld [vmem:[#allocation5] sm:$0xff]   ;;  %v94_v59 = vsub.s32 0, %v93_v56 }
  0x2c   :  { %v706_v15 = vld [vmem:[#allocation3 + $0x8] sm:$0xff]   ;;  %v708_v17 = vld [vmem:[#allocation3] sm:$0xff]   ;;  %v709_v19 = vld [vmem:[%s970_s5 + $0x38] sm:$0xff]  }
  0x2d   :  { %v896_v18 = vld [vmem:[%s966_s1] sm:$0xf]  ;;  %v710_v21 = vld [vmem:[%s970_s5 + $0x30] sm:$0xff]   ;;  %v711_v22 = vld [vmem:[%s970_s5 + $0x28] sm:$0xff]  }
  0x2e   :  { %617 = vmatpush3.bf16.msra.mxu0 %v695_v4  ;;  %637 = vmatpush3.bf16.msra.mxu1 %v696_v5  ;;  %v904_v20 = vld [vmem:[%s965_s0] sm:$0xf]  ;;  %v713_v24 = vld [vmem:[%s970_s5 + $0x18] sm:$0xff]   ;;  %v714_v25 = vld [vmem:[%s970_s5 + $0x10] sm:$0xff]   ;;  %v88_v54 = vunpack.c.l.bf16 %v896_v18 }
  0x2f   :  { %618 = vmatprep.subr.bf16.mxu0 %v794_v1  ;;  %638 = vmatprep.subr.bf16.mxu1 %v794_v1  ;;  %v712_v23 = vld [vmem:[%s970_s5 + $0x20] sm:$0xff]   ;;  %v715_v26 = vld [vmem:[%s970_s5 + $0x8] sm:$0xff]   ;;  %v718_v29 = vld [vmem:[#allocation7 + $0x10] sm:$0xff]   ;;  %v87_v55 = vunpack.c.l.bf16 %v904_v20 }
  0x30   :  { %v716_v27 = vld [vmem:[%s970_s5] sm:$0xff]   ;;  %v719_v43 = vld [vmem:[#allocation7 + $0x8] sm:$0xff]  }
  0x31   :  { %v717_v28 = vld [vmem:[#allocation7 + $0x18] sm:$0xff]   ;;  %v720_v44 = vld [vmem:[#allocation7] sm:$0xff]   ;;  %v89_v60 = vmul.f32 %v88_v54, %v87_v55 }
  0x32   :  { %619 = vmatpush3.bf16.msra.mxu0 %v697_v6  ;;  %639 = vmatpush3.bf16.msra.mxu1 %v698_v7  ;;  %v564_v32 = vld [vmem:[%s969_s4] ss:$0 sm:$0xff] }
  0x33   :  { %620 = vmatprep.subr.bf16.mxu0 %v794_v1  ;;  %640 = vmatprep.subr.bf16.mxu1 %v794_v1  ;;  %v565_v45 = vld [vmem:[%s971_s6] ss:$0 sm:$0xff] }
  0x34   :  { %v90_v57 = vld [vmem:[%s974_s9] sm:$0x1] }
  0x35   :  { %v91_v58 = vunpack.c.l.bf16 %v90_v57  ;;  %v514_v63 = vld [vmem:[%s975_s10] sm:$0x1] }
  0x36   :  { %621 = vmatpush3.bf16.msra.mxu0 %v699_v8  ;;  %641 = vmatpush3.bf16.msra.mxu1 %v700_v9  ;;  %v515_v0 = vunpack.c.l.bf16 %v514_v63 }
  0x37   :  { %622 = vmatprep.subr.bf16.mxu0 %v794_v1  ;;  %642 = vmatprep.subr.bf16.mxu1 %v794_v1  ;;  %v95_v61 = vrot.slane %v91_v58, %v94_v59 }
  0x38   :  { %v519_v4 = vrot.slane %v515_v0, %v94_v59 }
  0x39   :  { %v96_v62 = vmul.f32 %v95_v61, %v89_v60 }
  0x3a   :  { %623 = vmatpush3.bf16.msra.mxu0 %v701_v10  ;;  %643 = vmatpush3.bf16.msra.mxu1 %v702_v11 }
  0x3b   :  { %624 = vmatprep.subr.bf16.mxu0 %v794_v1  ;;  %644 = vmatprep.subr.bf16.mxu1 %v794_v1 }
  0x3c   :  { %97 = vadd.xlane.f32.xlu0 %v96_v62 }
  0x3e   :  { %625 = vmatpush3.bf16.msra.mxu0 %v703_v12  ;;  %645 = vmatpush3.bf16.msra.mxu1 %v704_v13  ;;  %v580_v12 = vld [vmem:[#allocation2] ss:$0 sm:$0xff] }
  0x3f   :  { %626 = vmatprep.subr.bf16.mxu0 %v794_v1  ;;  %646 = vmatprep.subr.bf16.mxu1 %v794_v1 }
  0x42   :  { %627 = vmatpush3.bf16.msra.mxu0 %v705_v14  ;;  %647 = vmatpush3.bf16.msra.mxu1 %v706_v15 }
  0x43   :  { %628 = vmatprep.subr.bf16.mxu0 %v794_v1  ;;  %648 = vmatprep.subr.bf16.mxu1 %v794_v1 }
  0x46   :  { %629 = vmatpush3.bf16.msra.mxu0 %v707_v16  ;;  %649 = vmatpush3.bf16.msra.mxu1 %v708_v17 }
  0x47   :  { %654 = vmatprep.subr.bf16.mxu0 %v794_v1  ;;  %674 = vmatprep.subr.bf16.mxu1 %v794_v1 }
  0x49   :  { %631 = vmatmul.mubr.bf16.vlgmr.msra.gmra.mxu0 %v896_v18  ;;  %651 = vmatmul.mubr.bf16.vlgmr.msra.gmra.mxu1 %v904_v20 }
  0x4a   :  { %655 = vmatpush3.bf16.msra.mxu0 %v709_v19  ;;  %670 = vmatprep.mubr.msk.bf16.mxu0 %vm795_vm0, %v794_v1 }
  0x4b   :  { %656 = vmatprep.subr.bf16.mxu0 %v794_v1  ;;  %682 = vmatprep.mubr.msk.bf16.mxu1 %vm795_vm0, %v794_v1 }
  0x4c   :  { %675 = vmatpush3.bf16.msra.mxu1 %v717_v28 }
  0x4d   :  { %676 = vmatprep.subr.bf16.mxu1 %v794_v1 }
  0x4e   :  { %657 = vmatpush3.bf16.msra.mxu0 %v710_v21 }
  0x4f   :  { %658 = vmatprep.subr.bf16.mxu0 %v794_v1 }
  0x50   :  { %677 = vmatpush3.bf16.msra.mxu1 %v718_v29 }
  0x51   :  { %678 = vmatprep.subr.bf16.mxu1 %v794_v1 }
  0x52   :  { %659 = vmatpush3.bf16.msra.mxu0 %v711_v22 }
  0x53   :  { %660 = vmatprep.subr.bf16.mxu0 %v794_v1 }
  0x54   :  { %679 = vmatpush3.bf16.msra.mxu1 %v719_v43 }
  0x55   :  { %680 = vmatprep.subr.bf16.mxu1 %v794_v1 }
  0x56   :  { %661 = vmatpush3.bf16.msra.mxu0 %v712_v23 }
  0x57   :  { %662 = vmatprep.subr.bf16.mxu0 %v794_v1 }
  0x58   :  { %681 = vmatpush3.bf16.msra.mxu1 %v720_v44 }
  0x5a   :  { %663 = vmatpush3.bf16.msra.mxu0 %v713_v24 }
  0x5b   :  { %664 = vmatprep.subr.bf16.mxu0 %v794_v1 }
  0x5e   :  { %665 = vmatpush3.bf16.msra.mxu0 %v714_v25 }
  0x5f   :  { %666 = vmatprep.subr.bf16.mxu0 %v794_v1 }
  0x62   :  { %667 = vmatpush3.bf16.msra.mxu0 %v715_v26 }
  0x63   :  { %668 = vmatprep.subr.bf16.mxu0 %v794_v1  ;;  %v574_v1 = vld [vmem:[%s973_s8] ss:$0 sm:$0xff] }
  0x66   :  { %669 = vmatpush3.bf16.msra.mxu0 %v716_v27 }
  0xc5   :  { %v98_v11 = vpop.xlane.xlu0 %97 }
 0x109   :  { %v213_v30 = vpop.f32.mrf.mxu0  ;;  %v301_v31 = vpop.f32.mrf.mxu1 }
 0x10a   :  { %v302_v33 = vadd.f32 %v301_v31, %v213_v30 }
 0x10b   :  { %v632_v34 = vpop.f32.mrf.mxu0  ;;  %v652_v35 = vpop.f32.mrf.mxu1 }
 0x10c   :  { %v314_v36 = vadd.f32 %v564_v32, %v302_v33 }
 0x10d   :  { %v216_v37 = vpop.f32.mrf.mxu0  ;;  %v304_v38 = vpop.f32.mrf.mxu1 }
 0x10e   :  { %v315_v39 = vmax.f32 %v314_v36, 0.0 }
 0x10f   :  { %v633_v40 = vpop.f32.mrf.mxu0  ;;  %v653_v41 = vpop.f32.mrf.mxu1 }
 0x110   :  { %v316_v42 = vpack.c.bf16 %v315_v39, %v315_v39 }
 0x112   :  { %671 = vmatmul.mubr.bf16.vlgmr.msra.gmra.mxu0 %v316_v42 }
 0x1d2   :  { %v422_v46 = vpop.f32.mrf.mxu0 }
 0x1d3   :  { %v423_v47 = vadd.f32 %v565_v45, %v422_v46 }
 0x1d4   :  { %v672_v48 = vpop.f32.mrf.mxu0 }
 0x1d5   :  { %v428_v49 = vmax.f32 %v423_v47, 0.0 }
 0x1d6   :  { %v425_v50 = vpop.f32.mrf.mxu0 }
 0x1d7   :  { %v429_v51 = vpack.c.bf16 %v428_v49, %v428_v49 }
 0x1d8   :  { %v673_v52 = vpop.f32.mrf.mxu0 }
 0x1d9   :  { %683 = vmatmul.mubr.msk.bf16.vlgmr.msra.gmra.mxu1 %vm469_vm1, %v429_v51 }
 0x299   :  { %v507_v2 = vpop.f32.mrf.mxu1 }
 0x29a   :  { %v508_v3 = vadd.f32 %v574_v1, %v507_v2 }
 0x29b   :  { %v684_v5 = vpop.f32.mrf.mxu1 }
 0x29c   :  { %v513_v6 = vmax.f32 %v508_v3, 0.0 }
 0x29d   :  { %v510_v7 = vpop.f32.mrf.mxu1 }
 0x29e   :  { %v520_v8 = vmul.f32 %v519_v4, %v513_v6 }
 0x29f   :  { %v685_v9 = vpop.f32.mrf.mxu1 }
 0x2a0   :  { %v522_v10 = vsel %vm521_vm2, %v520_v8, 0.0 }
 0x2a1   :  { %523 = vadd.xlane.f32.xlu0 %v522_v10 }
 0x32a   :  { %v524_v13 = vpop.xlane.xlu0 %523 }
 0x32b   :  { %v525_v14 = vadd.f32 %v524_v13, %v98_v11 }
 0x32d   :  { %v533_v15 = vadd.f32 %v580_v12, %v525_v14 }
 0x32f   :  { %v581_v16 = vmul.f32 -1.442695, %v533_v15 }
 0x331   :  { %721 = vpow2.f32 %v581_v16 }
 0x33e   :  { %v722_v17 = vpop.eup %721 }
 0x33f   :  { %v537_v18 = vadd.f32 1.0, %v722_v17 }
 0x341   :  { %723 = vrcp.f32 %v537_v18 }
 0x34e   :  { %v724_v19 = vpop.eup %723 }
 0x34f   :  { %541 = vst.msk [vmem:[%s977_s12] sm:$0xff] %vm540_vm3, %v724_v19 }
 0x350   :  { %546 = vsyncpa [#allocation4], 1 }
 0x351   :  { %547 = vsyncpa [#allocation6], 1 }

</bundles_post_ra>
